<compile_context>
chip_gen: v7x
topology: tpu7x:2x2x1
jax: 0.10.0
libtpu: 0.0.40
codegen_flags: <defaults>
</compile_context>

<pallas_src>
import functools

import jax
import jax.numpy as jnp
import numpy as np
from jax.experimental import pallas as pl
from jax.experimental.pallas import tpu as pltpu


def _round_up(n, m):
    return ((n + m - 1) // m) * m


# murmur3 fmix32 constants (as wrapped int32) + golden-ratio seed mixer.
_FMIX_C1 = np.int32(0x85EBCA6B - (1 << 32))   # -2048144789
_FMIX_C2 = np.int32(0xC2B2AE35 - (1 << 32))   # -1028477387
_GOLDEN = np.int32(0x9E3779B9 - (1 << 32))    # -1640531527
_MASK23 = np.int32((1 << 23) - 1)


def mlp_kernel(seed_ref, x_ref,
               w1_ref, b1_ref, w2_ref, b2_ref, w3_ref, b3_ref,
               w4_ref, b4_ref, w5_ref, b5_ref,
               o_ref, *, p, train, mxu_dtype):
    """Transposed forward: h = ReLU(W @ h + b), h is [features, B_tile]."""
    hidden = w1_ref.shape[0]
    tb = x_ref.shape[1]

    if train:
        # keep iff 23-bit hash >= p * 2^23  -> drop probability ~= p
        thresh = jnp.int32(min(int(round(p * (1 << 23))), (1 << 23) - 1))
        inv_keep = jnp.float32(1.0 / (1.0 - p)) if p < 1.0 else jnp.float32(0.0)

        # Unique int32 counter per (layer, row, GLOBAL column).  All int32 math:
        # multiplies wrap (two's complement), shifts are arithmetic, which keeps
        # the low 23 bits well mixed -- plenty for a dropout mask.
        col_off = pl.program_id(0) * tb
        row = jax.lax.broadcasted_iota(jnp.int32, (hidden, tb), 0)
        col = jax.lax.broadcasted_iota(jnp.int32, (hidden, tb), 1) + col_off
        base = row * jnp.int32(4) + col * jnp.int32(4 * hidden)
        seed_mix = seed_ref[0] * _GOLDEN

        def dropout(h, layer):
            v = (base + jnp.int32(layer)) ^ seed_mix
            v = v ^ (v >> 16)
            v = v * _FMIX_C1
            v = v ^ (v >> 13)
            v = v * _FMIX_C2
            v = v ^ (v >> 16)
            r = v & _MASK23                       # 23-bit "uniform" value
            return jnp.where(r >= thresh, h * inv_keep, 0.0)

    def lin_relu(h, w_ref, b_ref):
        z = jnp.dot(w_ref[...], h.astype(mxu_dtype),
                    preferred_element_type=jnp.float32) + b_ref[...]
        return jnp.maximum(z, 0.0)                 # bias/ReLU stay in f32 (VPU)

    h = x_ref[...]
    h = lin_relu(h, w1_ref, b1_ref)
    if train:
        h = dropout(h, 0)
    h = lin_relu(h, w2_ref, b2_ref)
    if train:
        h = dropout(h, 1)
    h = lin_relu(h, w3_ref, b3_ref)
    if train:
        h = dropout(h, 2)
    h = lin_relu(h, w4_ref, b4_ref)
    if train:
        h = dropout(h, 3)

    z = jnp.dot(w5_ref[...], h.astype(mxu_dtype),
                preferred_element_type=jnp.float32) + b5_ref[...]
    # sigmoid: exp and the reciprocal both land on the EUP slot (approx vrcp).
    o_ref[...] = pl.reciprocal(1.0 + jnp.exp(-z), approx=True).astype(o_ref.dtype)


def init_params(key, hidden_size):
    """torch.nn.Linear default init U(-1/sqrt(fan_in), 1/sqrt(fan_in)).
    Weights stored [out_features, in_features], biases [out_features, 1]."""
    dims = [(hidden_size, 2), (hidden_size, hidden_size), (hidden_size, hidden_size),
            (hidden_size, hidden_size), (1, hidden_size)]
    params = []
    for (fan_out, fan_in) in dims:
        key, kw, kb = jax.random.split(key, 3)
        bound = 1.0 / np.sqrt(fan_in)
        w = jax.random.uniform(kw, (fan_out, fan_in), jnp.float32, -bound, bound)
        b = jax.random.uniform(kb, (fan_out, 1), jnp.float32, -bound, bound)
        params += [w, b]
    return tuple(params)


@functools.partial(jax.jit, static_argnames=("p", "train", "mxu_dtype", "tb"))
def network4_forward(x, params, *, p=0.1, train=False, seed=0,
                     mxu_dtype=jnp.float32, tb=512):
    """Forward pass of Network_4.  train=False == torch eval mode (dropout is
    identity); train=True enables MC dropout via the in-kernel hash RNG."""
    B, F = x.shape
    H = params[0].shape[0]

    # Batch tile: lane-dense (multiple of 128), bounded so the per-step working
    # set stays far below v7x's 64 MiB VMEM even with double-buffering.
    tb_eff = min(tb, _round_up(max(B, 1), 128))
    b_pad = _round_up(B, tb_eff)
    num_tiles = b_pad // tb_eff

    # Transpose so the batch sits on the lane axis; pad to a whole number of tiles.
    x_t = x.T.astype(mxu_dtype)                           # [2, B]
    if b_pad != B:
        x_t = jnp.pad(x_t, ((0, 0), (0, b_pad - B)))

    # Weights feed the MXU in mxu_dtype (bf16 halves operand traffic on v6e/v7x);
    # biases stay f32 for the VPU bias-add/ReLU path.
    args = [a.astype(mxu_dtype) if i % 2 == 0 else a.astype(jnp.float32)
            for i, a in enumerate(params)]

    seed_arr = jnp.asarray(seed, dtype=jnp.int32).reshape(1)

    in_specs = [pl.BlockSpec((F, tb_eff), lambda i, s: (0, i))]     # x tile
    for a in args:                                                   # resident params
        in_specs.append(pl.BlockSpec(a.shape, lambda i, s: (0, 0)))

    flops = 2 * b_pad * (F * H + 3 * H * H + H)
    cost = pl.CostEstimate(
        flops=flops,
        transcendentals=2 * b_pad,
        bytes_accessed=(x_t.size * x_t.dtype.itemsize + b_pad * 4
                        + sum(a.size * a.dtype.itemsize for a in args)),
    )

    out_t = pl.pallas_call(
        functools.partial(mlp_kernel, p=float(p), train=bool(train),
                          mxu_dtype=mxu_dtype),
        out_shape=jax.ShapeDtypeStruct((1, b_pad), jnp.float32),
        grid_spec=pltpu.PrefetchScalarGridSpec(
            num_scalar_prefetch=1,
            grid=(num_tiles,),
            in_specs=in_specs,
            out_specs=pl.BlockSpec((1, tb_eff), lambda i, s: (0, i)),
        ),
        compiler_params=pltpu.CompilerParams(
            dimension_semantics=("parallel",)),      # v7x: shard tiles across 2 TCs
        cost_estimate=cost,
    )(seed_arr, x_t, *args)

    return out_t[:, :B].T                                 # back to [B, 1]


def _reference_forward(x, params):
    # pure-JAX reference (eval mode: dropout is identity), torch-layout weights
    w1, b1, w2, b2, w3, b3, w4, b4, w5, b5 = params
    h = jnp.maximum(x @ w1.T + b1.T, 0.0)
    h = jnp.maximum(h @ w2.T + b2.T, 0.0)
    h = jnp.maximum(h @ w3.T + b3.T, 0.0)
    h = jnp.maximum(h @ w4.T + b4.T, 0.0)
    return jax.nn.sigmoid(h @ w5.T + b5.T)


if __name__ == "__main__":
    hidden_size = 32
    p = 0.1

    key = jax.random.PRNGKey(0)
    key, kx = jax.random.split(key)
    params = init_params(key, hidden_size)

    # --- eval mode, f32 MXU path, single tile (B=8 padded to 128 lanes) ---
    x_small = jax.random.normal(kx, (8, 2), jnp.float32)
    out = jax.block_until_ready(network4_forward(x_small, params, p=p, train=False))
    ref = _reference_forward(x_small, params)
    np.testing.assert_allclose(np.asarray(out), np.asarray(ref), rtol=2e-3, atol=2e-3)

    # --- eval mode, multi-tile grid (3 tiles of 128) with ragged batch padding ---
    key, kx2 = jax.random.split(key)
    x_big = jax.random.normal(kx2, (300, 2), jnp.float32)
    out_big = jax.block_until_ready(
        network4_forward(x_big, params, p=p, train=False, tb=128))
    ref_big = _reference_forward(x_big, params)
    np.testing.assert_allclose(np.asarray(out_big), np.asarray(ref_big),
                               rtol=2e-3, atol=2e-3)

    # --- eval mode, bf16 MXU operands (f32 accumulate / elementwise) ---
    out_bf16 = jax.block_until_ready(
        network4_forward(x_small, params, p=p, train=False, mxu_dtype=jnp.bfloat16))
    np.testing.assert_allclose(np.asarray(out_bf16), np.asarray(ref),
                               rtol=5e-2, atol=5e-2)

    # --- MC-dropout (train) mode: runs, seed-dependent masks, valid probabilities ---
    out_mc1 = jax.block_until_ready(
        network4_forward(x_big, params, p=p, train=True, seed=123, tb=128))
    out_mc2 = jax.block_until_ready(
        network4_forward(x_big, params, p=p, train=True, seed=456, tb=128))
    mc1, mc2 = np.asarray(out_mc1), np.asarray(out_mc2)
    assert mc1.shape == (300, 1) and mc2.shape == (300, 1)
    assert np.all(np.isfinite(mc1)) and np.all(mc1 > 0.0) and np.all(mc1 < 1.0)
    assert np.all(np.isfinite(mc2)) and np.all(mc2 > 0.0) and np.all(mc2 < 1.0)
    assert not np.allclose(mc1, mc2)   # different seeds -> different MC samples

    print("KERNEL_OK")
</pallas_src>

<mosaic_0001>
module attributes {stable_mosaic.version = 11 : i64} {
  func.func @mlp_kernel(%arg0: i32, %arg1: memref<1xi32, #tpu.memory_space<smem>>, %arg2: memref<2x128xf32, #tpu.memory_space<vmem>>, %arg3: memref<32x2xf32, #tpu.memory_space<vmem>>, %arg4: memref<32x1xf32, #tpu.memory_space<vmem>>, %arg5: memref<32x32xf32, #tpu.memory_space<vmem>>, %arg6: memref<32x1xf32, #tpu.memory_space<vmem>>, %arg7: memref<32x32xf32, #tpu.memory_space<vmem>>, %arg8: memref<32x1xf32, #tpu.memory_space<vmem>>, %arg9: memref<32x32xf32, #tpu.memory_space<vmem>>, %arg10: memref<32x1xf32, #tpu.memory_space<vmem>>, %arg11: memref<1x32xf32, #tpu.memory_space<vmem>>, %arg12: memref<1x1xf32, #tpu.memory_space<vmem>>, %arg13: memref<1x128xf32, #tpu.memory_space<vmem>>) attributes {dimension_semantics = [#tpu.dimension_semantics<parallel>], iteration_bounds = array<i64: 1>, scalar_prefetch = 1 : i64, scratch_operands = 0 : i64, tpu.core_type = #tpu.core_type<tc>, window_params = [{transform_indices = @transform_0, window_bounds = array<i64: 2, 128>}, {pipeline_mode = #tpu.pipeline_mode<synchronous>, transform_indices = @transform_1, window_bounds = array<i64: 32, 2>}, {pipeline_mode = #tpu.pipeline_mode<synchronous>, transform_indices = @transform_2, window_bounds = array<i64: 32, 1>}, {pipeline_mode = #tpu.pipeline_mode<synchronous>, transform_indices = @transform_3, window_bounds = array<i64: 32, 32>}, {pipeline_mode = #tpu.pipeline_mode<synchronous>, transform_indices = @transform_4, window_bounds = array<i64: 32, 1>}, {pipeline_mode = #tpu.pipeline_mode<synchronous>, transform_indices = @transform_5, window_bounds = array<i64: 32, 32>}, {pipeline_mode = #tpu.pipeline_mode<synchronous>, transform_indices = @transform_6, window_bounds = array<i64: 32, 1>}, {pipeline_mode = #tpu.pipeline_mode<synchronous>, transform_indices = @transform_7, window_bounds = array<i64: 32, 32>}, {pipeline_mode = #tpu.pipeline_mode<synchronous>, transform_indices = @transform_8, window_bounds = array<i64: 32, 1>}, {pipeline_mode = #tpu.pipeline_mode<synchronous>, transform_indices = @transform_9, window_bounds = array<i64: 1, 32>}, {pipeline_mode = #tpu.pipeline_mode<synchronous>, transform_indices = @transform_10, window_bounds = array<i64: 1, 1>}, {transform_indices = @transform_11, window_bounds = array<i64: 1, 128>}]} {
    %c0 = arith.constant 0 : index
    %c0_0 = arith.constant 0 : index
    %0 = vector.load %arg2[%c0, %c0_0] : memref<2x128xf32, #tpu.memory_space<vmem>>, vector<2x128xf32>
    %c0_1 = arith.constant 0 : index
    %c0_2 = arith.constant 0 : index
    %1 = vector.load %arg3[%c0_1, %c0_2] : memref<32x2xf32, #tpu.memory_space<vmem>>, vector<32x2xf32>
    %cst = arith.constant dense<0.000000e+00> : vector<32x128xf32>
    %2 = tpu.matmul %1, %0, %cst {dimension_numbers = #tpu.dot_dimension_numbers<[1], [0], [0], [1], [0, 0, 1, 1], [], []>} : vector<32x2xf32>, vector<2x128xf32>, vector<32x128xf32> -> vector<32x128xf32>
    %c0_3 = arith.constant 0 : index
    %c0_4 = arith.constant 0 : index
    %3 = vector.load %arg4[%c0_3, %c0_4] : memref<32x1xf32, #tpu.memory_space<vmem>>, vector<32x1xf32>
    %4 = vector.broadcast %3 : vector<32x1xf32> to vector<32x128xf32>
    %5 = arith.addf %2, %4 : vector<32x128xf32>
    %cst_5 = arith.constant 0.000000e+00 : f32
    %6 = vector.broadcast %cst_5 : f32 to vector<32x128xf32>
    %7 = arith.maximumf %5, %6 : vector<32x128xf32>
    %c0_6 = arith.constant 0 : index
    %c0_7 = arith.constant 0 : index
    %8 = vector.load %arg5[%c0_6, %c0_7] : memref<32x32xf32, #tpu.memory_space<vmem>>, vector<32x32xf32>
    %cst_8 = arith.constant dense<0.000000e+00> : vector<32x128xf32>
    %9 = tpu.matmul %8, %7, %cst_8 {dimension_numbers = #tpu.dot_dimension_numbers<[1], [0], [0], [1], [0, 0, 1, 1], [], []>} : vector<32x32xf32>, vector<32x128xf32>, vector<32x128xf32> -> vector<32x128xf32>
    %c0_9 = arith.constant 0 : index
    %c0_10 = arith.constant 0 : index
    %10 = vector.load %arg6[%c0_9, %c0_10] : memref<32x1xf32, #tpu.memory_space<vmem>>, vector<32x1xf32>
    %11 = vector.broadcast %10 : vector<32x1xf32> to vector<32x128xf32>
    %12 = arith.addf %9, %11 : vector<32x128xf32>
    %cst_11 = arith.constant 0.000000e+00 : f32
    %13 = vector.broadcast %cst_11 : f32 to vector<32x128xf32>
    %14 = arith.maximumf %12, %13 : vector<32x128xf32>
    %c0_12 = arith.constant 0 : index
    %c0_13 = arith.constant 0 : index
    %15 = vector.load %arg7[%c0_12, %c0_13] : memref<32x32xf32, #tpu.memory_space<vmem>>, vector<32x32xf32>
    %cst_14 = arith.constant dense<0.000000e+00> : vector<32x128xf32>
    %16 = tpu.matmul %15, %14, %cst_14 {dimension_numbers = #tpu.dot_dimension_numbers<[1], [0], [0], [1], [0, 0, 1, 1], [], []>} : vector<32x32xf32>, vector<32x128xf32>, vector<32x128xf32> -> vector<32x128xf32>
    %c0_15 = arith.constant 0 : index
    %c0_16 = arith.constant 0 : index
    %17 = vector.load %arg8[%c0_15, %c0_16] : memref<32x1xf32, #tpu.memory_space<vmem>>, vector<32x1xf32>
    %18 = vector.broadcast %17 : vector<32x1xf32> to vector<32x128xf32>
    %19 = arith.addf %16, %18 : vector<32x128xf32>
    %cst_17 = arith.constant 0.000000e+00 : f32
    %20 = vector.broadcast %cst_17 : f32 to vector<32x128xf32>
    %21 = arith.maximumf %19, %20 : vector<32x128xf32>
    %c0_18 = arith.constant 0 : index
    %c0_19 = arith.constant 0 : index
    %22 = vector.load %arg9[%c0_18, %c0_19] : memref<32x32xf32, #tpu.memory_space<vmem>>, vector<32x32xf32>
    %cst_20 = arith.constant dense<0.000000e+00> : vector<32x128xf32>
    %23 = tpu.matmul %22, %21, %cst_20 {dimension_numbers = #tpu.dot_dimension_numbers<[1], [0], [0], [1], [0, 0, 1, 1], [], []>} : vector<32x32xf32>, vector<32x128xf32>, vector<32x128xf32> -> vector<32x128xf32>
    %c0_21 = arith.constant 0 : index
    %c0_22 = arith.constant 0 : index
    %24 = vector.load %arg10[%c0_21, %c0_22] : memref<32x1xf32, #tpu.memory_space<vmem>>, vector<32x1xf32>
    %25 = vector.broadcast %24 : vector<32x1xf32> to vector<32x128xf32>
    %26 = arith.addf %23, %25 : vector<32x128xf32>
    %cst_23 = arith.constant 0.000000e+00 : f32
    %27 = vector.broadcast %cst_23 : f32 to vector<32x128xf32>
    %28 = arith.maximumf %26, %27 : vector<32x128xf32>
    %c0_24 = arith.constant 0 : index
    %c0_25 = arith.constant 0 : index
    %29 = vector.load %arg11[%c0_24, %c0_25] : memref<1x32xf32, #tpu.memory_space<vmem>>, vector<1x32xf32>
    %cst_26 = arith.constant dense<0.000000e+00> : vector<1x128xf32>
    %30 = tpu.matmul %29, %28, %cst_26 {dimension_numbers = #tpu.dot_dimension_numbers<[1], [0], [0], [1], [0, 0, 1, 1], [], []>} : vector<1x32xf32>, vector<32x128xf32>, vector<1x128xf32> -> vector<1x128xf32>
    %c0_27 = arith.constant 0 : index
    %c0_28 = arith.constant 0 : index
    %31 = vector.load %arg12[%c0_27, %c0_28] : memref<1x1xf32, #tpu.memory_space<vmem>>, vector<1x1xf32>
    %32 = vector.broadcast %31 : vector<1x1xf32> to vector<1x128xf32>
    %33 = arith.addf %30, %32 : vector<1x128xf32>
    %cst_29 = arith.constant 0.000000e+00 : f32
    %34 = vector.broadcast %cst_29 : f32 to vector<1x128xf32>
    %35 = arith.subf %34, %33 : vector<1x128xf32>
    %36 = math.exp %35 : vector<1x128xf32>
    %cst_30 = arith.constant 1.000000e+00 : f32
    %37 = vector.broadcast %cst_30 : f32 to vector<1x128xf32>
    %38 = arith.addf %37, %36 : vector<1x128xf32>
    %39 = tpu.reciprocal %38 {approx = true} : vector<1x128xf32> -> vector<1x128xf32>
    %c0_31 = arith.constant 0 : index
    %c0_32 = arith.constant 0 : index
    %40 = vector.load %arg13[%c0_31, %c0_32] : memref<1x128xf32, #tpu.memory_space<vmem>>, vector<1x128xf32>
    tpu.vector_store %arg13[%c0_31, %c0_32], %39 {strides = array<i32>} : memref<1x128xf32, #tpu.memory_space<vmem>>, vector<1x128xf32>,
    return
  }
  func.func @transform_0(%arg0: i32, %arg1: memref<1xi32, #tpu.memory_space<smem>>) -> (i32, i32) {
    %c0_i32 = arith.constant 0 : i32
    %c0_i32_0 = arith.constant 0 : i32
    return %c0_i32, %arg0 : i32, i32
  }
  func.func @transform_1(%arg0: i32, %arg1: memref<1xi32, #tpu.memory_space<smem>>) -> (i32, i32) {
    %c0_i32 = arith.constant 0 : i32
    %c0_i32_0 = arith.constant 0 : i32
    %c0_i32_1 = arith.constant 0 : i32
    return %c0_i32, %c0_i32_0 : i32, i32
  }
  func.func @transform_2(%arg0: i32, %arg1: memref<1xi32, #tpu.memory_space<smem>>) -> (i32, i32) {
    %c0_i32 = arith.constant 0 : i32
    %c0_i32_0 = arith.constant 0 : i32
    %c0_i32_1 = arith.constant 0 : i32
    return %c0_i32, %c0_i32_0 : i32, i32
  }
  func.func @transform_3(%arg0: i32, %arg1: memref<1xi32, #tpu.memory_space<smem>>) -> (i32, i32) {
    %c0_i32 = arith.constant 0 : i32
    %c0_i32_0 = arith.constant 0 : i32
    %c0_i32_1 = arith.constant 0 : i32
    return %c0_i32, %c0_i32_0 : i32, i32
  }
  func.func @transform_4(%arg0: i32, %arg1: memref<1xi32, #tpu.memory_space<smem>>) -> (i32, i32) {
    %c0_i32 = arith.constant 0 : i32
    %c0_i32_0 = arith.constant 0 : i32
    %c0_i32_1 = arith.constant 0 : i32
    return %c0_i32, %c0_i32_0 : i32, i32
  }
  func.func @transform_5(%arg0: i32, %arg1: memref<1xi32, #tpu.memory_space<smem>>) -> (i32, i32) {
    %c0_i32 = arith.constant 0 : i32
    %c0_i32_0 = arith.constant 0 : i32
    %c0_i32_1 = arith.constant 0 : i32
    return %c0_i32, %c0_i32_0 : i32, i32
  }
  func.func @transform_6(%arg0: i32, %arg1: memref<1xi32, #tpu.memory_space<smem>>) -> (i32, i32) {
    %c0_i32 = arith.constant 0 : i32
    %c0_i32_0 = arith.constant 0 : i32
    %c0_i32_1 = arith.constant 0 : i32
    return %c0_i32, %c0_i32_0 : i32, i32
  }
  func.func @transform_7(%arg0: i32, %arg1: memref<1xi32, #tpu.memory_space<smem>>) -> (i32, i32) {
    %c0_i32 = arith.constant 0 : i32
    %c0_i32_0 = arith.constant 0 : i32
    %c0_i32_1 = arith.constant 0 : i32
    return %c0_i32, %c0_i32_0 : i32, i32
  }
  func.func @transform_8(%arg0: i32, %arg1: memref<1xi32, #tpu.memory_space<smem>>) -> (i32, i32) {
    %c0_i32 = arith.constant 0 : i32
    %c0_i32_0 = arith.constant 0 : i32
    %c0_i32_1 = arith.constant 0 : i32
    return %c0_i32, %c0_i32_0 : i32, i32
  }
  func.func @transform_9(%arg0: i32, %arg1: memref<1xi32, #tpu.memory_space<smem>>) -> (i32, i32) {
    %c0_i32 = arith.constant 0 : i32
    %c0_i32_0 = arith.constant 0 : i32
    %c0_i32_1 = arith.constant 0 : i32
    return %c0_i32, %c0_i32_0 : i32, i32
  }
  func.func @transform_10(%arg0: i32, %arg1: memref<1xi32, #tpu.memory_space<smem>>) -> (i32, i32) {
    %c0_i32 = arith.constant 0 : i32
    %c0_i32_0 = arith.constant 0 : i32
    %c0_i32_1 = arith.constant 0 : i32
    return %c0_i32, %c0_i32_0 : i32, i32
  }
  func.func @transform_11(%arg0: i32, %arg1: memref<1xi32, #tpu.memory_space<smem>>) -> (i32, i32) {
    %c0_i32 = arith.constant 0 : i32
    %c0_i32_0 = arith.constant 0 : i32
    return %c0_i32, %arg0 : i32, i32
  }
}

</mosaic_0001>

<bundles_post_ra>
// kernel: network4_forward.1
= control target key start
LH: loop header
LB: loop body
LE: loop exit
PB: predicated region body
PF: predicated region fallthrough
CT: control target
= control target key end

     0   :  { %vm84_vm0 = vcmask 1041408   ;;  %vm71_vm1 = vcmask 15360   ;;  %v812_v3 = vmov 0   ;;  %vm205_vm2 = vcmask 261120   ;;  %s1008_s0 = inlined_call_operand.<no memory space> [shape: s32[1], index: 0, kind: input, shape index: {}]   ;;  %s1009_s1 = inlined_call_operand.vmem [shape: f32[2,128], index: 1, kind: input, shape index: {}]   ;;  %s1010_s2 = inlined_call_operand.vmem [shape: f32[32,2], index: 2, kind: input, shape index: {}]   ;;  %s1011_s3 = inlined_call_operand.vmem [shape: f32[32,1], index: 3, kind: input, shape index: {}]   ;;  %s1012_s11 = inlined_call_operand.<no memory space> [shape: f32[1,1], index: 11, kind: input, shape index: {}]   ;;  %s1013_s5 = inlined_call_operand.vmem [shape: f32[32,1], index: 5, kind: input, shape index: {}]   ;;  %s1014_s7 = inlined_call_operand.vmem [shape: f32[32,1], index: 7, kind: input, shape index: {}]   ;;  %s1015_s9 = inlined_call_operand.vmem [shape: f32[32,1], index: 9, kind: input, shape index: {}]   ;;  %s1016_s4 = inlined_call_operand.vmem [shape: f32[32,32], index: 4, kind: input, shape index: {}]   ;;  %s1017_s6 = inlined_call_operand.vmem [shape: f32[32,32], index: 6, kind: input, shape index: {}]   ;;  %s1018_s8 = inlined_call_operand.vmem [shape: f32[32,32], index: 8, kind: input, shape index: {}]   ;;  %s1019_s10 = inlined_call_operand.vmem [shape: f32[1,32], index: 10, kind: input, shape index: {}]   ;;  %s1020_s12 = inlined_call_operand.vmem [shape: f32[1,128], index: 12, kind: output, shape index: {}]  }
   0x1   :  { %v42_v0 = vld [vmem:[%s1009_s1] sm:$0x3]  ;;  %v44_v2 = vld [vmem:[%s1010_s2 + $0x8] sm:$0xff]  ;;  %806 = vset.pattern.permute.xlu0 %v812_v3  ;;  %807 = vset.pattern.permute.xlu1 %v812_v3  ;;  %v18_v4 = vstv %s1012_s11  ;;  %v45_v5 = vld [vmem:[%s1010_s2 + $0x10] sm:$0xff]  ;;  %vm814_vm3 = vmmov 0  }
   0x2   :  { %v43_v1 = vld [vmem:[%s1010_s2] sm:$0xff]  ;;  %711 = vmatprep.subr.msk.mxu0 %vm84_vm0, %v42_v0  ;;  %19 = vst [vmem:[#allocation4] sm:$0x1] %v18_v4  ;;  %v49_v7 = vld [vmem:[%s1011_s3 + $0x10] sm:$0xff]  ;;  %v48_v8 = vld [vmem:[%s1011_s3 + $0x8] sm:$0xff] }
   0x3   :  { %713 = vmatprep.mubr.msk.f32.mxu0 %vm71_vm1, %v43_v1  ;;  %v47_v6 = vld [vmem:[%s1011_s3] sm:$0xff]  ;;  %712 = vmatpush3.msk.msra.mxu0 %vm84_vm0, %v42_v0  ;;  %v46_v9 = vld [vmem:[%s1010_s2 + $0x18] sm:$0xff]  ;;  %v182_v12 = vld [vmem:[%s1013_s5 + $0x8] sm:$0xff] }
   0x4   :  { %53 = vperm.xlu0 %806, %v47_v6   ;;  %714 = vmatmul.mubr.msk.f32.vlgmr.msra.gmra.mrb[0].mxu0 %vm71_vm1, %v44_v2  ;;  %v50_v10 = vld [vmem:[%s1011_s3 + $0x18] sm:$0xff]  ;;  %v181_v11 = vld [vmem:[%s1013_s5] sm:$0xff]  ;;  %v183_v13 = vld [vmem:[%s1013_s5 + $0x10] sm:$0xff] }
   0x5   :  { %63 = vperm.xlu1 %807, %v49_v7   ;;  %716 = vmatprep.mubr.msk.f32.mxu0 %vm71_vm1, %v45_v5  ;;  %v184_v14 = vld [vmem:[%s1013_s5 + $0x18] sm:$0xff]  ;;  %v311_v15 = vld [vmem:[%s1014_s7] sm:$0xff]  ;;  %v312_v16 = vld [vmem:[%s1014_s7 + $0x8] sm:$0xff] }
   0x6   :  { %v313_v17 = vld [vmem:[%s1014_s7 + $0x10] sm:$0xff]  ;;  %v314_v18 = vld [vmem:[%s1014_s7 + $0x18] sm:$0xff]  ;;  %v440_v19 = vld [vmem:[%s1015_s9] sm:$0xff] }
   0x7   :  { %v441_v20 = vld [vmem:[%s1015_s9 + $0x8] sm:$0xff]  ;;  %v442_v21 = vld [vmem:[%s1015_s9 + $0x10] sm:$0xff]  ;;  %v443_v22 = vld [vmem:[%s1015_s9 + $0x18] sm:$0xff] }
   0x8   :  { %58 = vperm.xlu0 %806, %v48_v8   ;;  %717 = vmatmul.mubr.msk.f32.gmra.mrb[2].mxu0 %vm71_vm1, %v46_v9  ;;  %v177_v24 = vld [vmem:[%s1016_s4] sm:$0xff]  ;;  %v178_v43 = vld [vmem:[%s1016_s4 + $0x8] sm:$0xff]  ;;  %v179_v44 = vld [vmem:[%s1016_s4 + $0x10] sm:$0xff] }
   0x9   :  { %68 = vperm.xlu1 %807, %v50_v10   ;;  %v566_v23 = vld [vmem:[#allocation4] sm:$0x1]  ;;  %727 = vmatprep.mubr.msk.f32.mxu1 %vm205_vm2, %v177_v24  ;;  %v180_v45 = vld [vmem:[%s1016_s4 + $0x18] sm:$0xff]  ;;  %v308_v1 = vld [vmem:[%s1017_s6 + $0x8] sm:$0xff] }
   0xa   :  { %v307_v46 = vld [vmem:[%s1017_s6] sm:$0xff]  ;;  %v309_v2 = vld [vmem:[%s1017_s6 + $0x10] sm:$0xff]  ;;  %v310_v3 = vld [vmem:[%s1017_s6 + $0x18] sm:$0xff] }
   0xb   :  { %741 = vmatprep.mubr.msk.f32.mxu0 %vm205_vm2, %v307_v46  ;;  %v436_v4 = vld [vmem:[%s1018_s8] sm:$0xff]  ;;  %v438_v24 = vld [vmem:[%s1018_s8 + $0x10] sm:$0xff] }
   0xc   :  { %187 = vperm.xlu0 %806, %v181_v11   ;;  %v565_v46 = vld [vmem:[%s1019_s10] sm:$0x1] }
   0xd   :  { %192 = vperm.xlu1 %807, %v182_v12  }
  0x10   :  { %197 = vperm.xlu0 %806, %v183_v13  }
  0x11   :  { %202 = vperm.xlu1 %807, %v184_v14  }
  0x14   :  { %317 = vperm.xlu0 %806, %v311_v15  }
  0x15   :  { %322 = vperm.xlu1 %807, %v312_v16  }
  0x18   :  { %327 = vperm.xlu0 %806, %v313_v17  }
  0x19   :  { %332 = vperm.xlu1 %807, %v314_v18  }
  0x1c   :  { %446 = vperm.xlu0 %806, %v440_v19  }
  0x1d   :  { %451 = vperm.xlu1 %807, %v441_v20  }
  0x20   :  { %456 = vperm.xlu0 %806, %v442_v21  }
  0x21   :  { %461 = vperm.xlu1 %807, %v443_v22  }
  0x24   :  { %569 = vperm.xlu0 %806, %v566_v23   ;;  %v437_v23 = vld [vmem:[%s1018_s8 + $0x8] sm:$0xff] }
  0x83   :  { %v54_v25 = vpop.permute.xlu0 %53 }
  0x84   :  { %v64_v26 = vpop.permute.xlu1 %63 }
  0x87   :  { %v59_v27 = vpop.permute.xlu0 %58 }
  0x88   :  { %v69_v33 = vpop.permute.xlu1 %68 }
  0x8b   :  { %v188_v48 = vpop.permute.xlu0 %187 }
  0x8c   :  { %v193_v47 = vpop.permute.xlu1 %192 }
  0x8f   :  { %v198_v57 = vpop.permute.xlu0 %197 }
  0x90   :  { %v203_v54 = vpop.permute.xlu1 %202 }
  0x93   :  { %v318_v6 = vpop.permute.xlu0 %317 }
  0x94   :  { %v323_v5 = vpop.permute.xlu1 %322 }
  0x97   :  { %v328_v15 = vpop.permute.xlu0 %327 }
  0x98   :  { %v333_v12 = vpop.permute.xlu1 %332 }
  0xd7   :  { %v715_v28 = vpop.f32.mrb[0].mxu0 }
  0xd8   :  { %v160_v29 = vadd.f32 %v715_v28, %v59_v27  ;;  %v154_v30 = vpop.f32.mrb[1].mxu0  ;;  %v815_v27 = vmov 0.0   ;;  %v452_v28 = vpop.permute.xlu1 %451 }
  0xd9   :  { %v155_v31 = vadd.f32 %v154_v30, %v54_v25  ;;  %v439_v25 = vld [vmem:[%s1018_s8 + $0x18] sm:$0xff] }
  0xda   :  { %v174_v32 = vmax.f32 %v160_v29, 0.0  ;;  %v447_v29 = vpop.permute.xlu0 %446 }
  0xdb   :  { %v173_v34 = vmax.f32 %v155_v31, 0.0  ;;  %v718_v35 = vpop.f32.mrb[2].mxu0 }
  0xdc   :  { %v170_v36 = vadd.f32 %v718_v35, %v69_v33  ;;  %v164_v37 = vpop.f32.mrb[3].mxu0  ;;  %v462_v35 = vpop.permute.xlu1 %461 }
  0xdd   :  { %v165_v38 = vadd.f32 %v164_v37, %v64_v26  ;;  %v772_v39 = vpack.c.bf16 %v174_v32, %v173_v34  ;;  %v813_v26 = vmov 0.0|0.0  }
  0xde   :  { %v176_v40 = vmax.f32 %v170_v36, 0.0 }
  0xdf   :  { %v175_v41 = vmax.f32 %v165_v38, 0.0  ;;  %773 = vmatprep.subr.bf16.mxu1 %v772_v39  ;;  %v457_v38 = vpop.permute.xlu0 %456 }
  0xe0   :  { %775 = vmatpush3.bf16.msra.mxu1 %v772_v39 }
  0xe1   :  { %v776_v42 = vpack.c.bf16 %v176_v40, %v175_v41 }
  0xe3   :  { %777 = vmatprep.subr.bf16.mxu1 %v776_v42 }
  0xe4   :  { %779 = vmatpush3.bf16.msra.mxu1 %v776_v42 }
  0xe7   :  { %728 = vmatmul.mubr.msk.f32.vlgmr.msra.gmra.mrb[0].mxu1 %vm205_vm2, %v178_v43 }
  0xe8   :  { %730 = vmatprep.mubr.msk.f32.mxu1 %vm205_vm2, %v179_v44 }
  0xeb   :  { %731 = vmatmul.mubr.msk.f32.gmra.mrb[2].mxu1 %vm205_vm2, %v180_v45 }
  0xec   :  { %755 = vmatprep.mubr.msk.f32.mxu1 %vm205_vm2, %v436_v4 }
 0x1ba   :  { %v729_v49 = vpop.f32.mrb[0].mxu1 }
 0x1bb   :  { %v290_v50 = vadd.f32 %v729_v49, %v193_v47  ;;  %v284_v51 = vpop.f32.mrb[1].mxu1  ;;  %v572_v47 = vlaneseq }
 0x1bc   :  { %v285_v52 = vadd.f32 %v284_v51, %v188_v48 }
 0x1bd   :  { %v304_v53 = vmax.f32 %v290_v50, 0.0  ;;  %v573_v48 = vshrl.u32 %v572_v47, 7  ;;  %v570_v50 = vpop.permute.xlu0 %569 }
 0x1be   :  { %v303_v55 = vmax.f32 %v285_v52, 0.0  ;;  %v732_v56 = vpop.f32.mrb[2].mxu1 }
 0x1bf   :  { %v300_v58 = vadd.f32 %v732_v56, %v203_v54  ;;  %v294_v59 = vpop.f32.mrb[3].mxu1  ;;  %v574_v49 = vsub.s32 0, %v573_v48 }
 0x1c0   :  { %v780_v60 = vpack.c.bf16 %v304_v53, %v303_v55  ;;  %v295_v61 = vadd.f32 %v294_v59, %v198_v57 }
 0x1c1   :  { %v306_v62 = vmax.f32 %v300_v58, 0.0  ;;  %v575_v51 = vrot.slane %v570_v50, %v574_v49 }
 0x1c2   :  { %v305_v63 = vmax.f32 %v295_v61, 0.0  ;;  %781 = vmatprep.subr.bf16.mxu0 %v780_v60 }
 0x1c3   :  { %783 = vmatpush3.bf16.msra.mxu0 %v780_v60 }
 0x1c4   :  { %v784_v0 = vpack.c.bf16 %v306_v62, %v305_v63 }
 0x1c6   :  { %785 = vmatprep.subr.bf16.mxu0 %v784_v0 }
 0x1c7   :  { %787 = vmatpush3.bf16.msra.mxu0 %v784_v0 }
 0x1c8   :  { %796 = vmatprep.subr.bf16.mxu0 %v813_v26 }
 0x1ca   :  { %742 = vmatmul.mubr.msk.f32.vlgmr.msra.gmra.mrb[4].mxu0 %vm205_vm2, %v308_v1 }
 0x1cb   :  { %744 = vmatprep.mubr.msk.f32.mxu0 %vm205_vm2, %v309_v2 }
 0x1ce   :  { %745 = vmatmul.mubr.msk.f32.gmra.mrb[6].mxu0 %vm205_vm2, %v310_v3 }
 0x1cf   :  { %769 = vmatprep.mubr.msk.f32.mxu0 %vm814_vm3, %v815_v27 }
 0x29d   :  { %v743_v7 = vpop.f32.mrb[4].mxu0 }
 0x29e   :  { %v419_v8 = vadd.f32 %v743_v7, %v323_v5  ;;  %v413_v9 = vpop.f32.mrb[5].mxu0 }
 0x29f   :  { %v414_v10 = vadd.f32 %v413_v9, %v318_v6 }
 0x2a0   :  { %v433_v11 = vmax.f32 %v419_v8, 0.0 }
 0x2a1   :  { %v432_v13 = vmax.f32 %v414_v10, 0.0  ;;  %v746_v14 = vpop.f32.mrb[6].mxu0 }
 0x2a2   :  { %v429_v16 = vadd.f32 %v746_v14, %v333_v12  ;;  %v423_v17 = vpop.f32.mrb[7].mxu0 }
 0x2a3   :  { %v788_v18 = vpack.c.bf16 %v433_v11, %v432_v13  ;;  %v424_v19 = vadd.f32 %v423_v17, %v328_v15 }
 0x2a4   :  { %v435_v20 = vmax.f32 %v429_v16, 0.0 }
 0x2a5   :  { %v434_v21 = vmax.f32 %v424_v19, 0.0  ;;  %789 = vmatprep.subr.bf16.mxu1 %v788_v18 }
 0x2a6   :  { %791 = vmatpush3.bf16.msra.mxu1 %v788_v18 }
 0x2a7   :  { %v792_v22 = vpack.c.bf16 %v435_v20, %v434_v21 }
 0x2a9   :  { %793 = vmatprep.subr.bf16.mxu1 %v792_v22 }
 0x2aa   :  { %795 = vmatpush3.bf16.msra.mxu1 %v792_v22 }
 0x2ad   :  { %756 = vmatmul.mubr.msk.f32.vlgmr.msra.gmra.mrb[4].mxu1 %vm205_vm2, %v437_v23 }
 0x2ae   :  { %758 = vmatprep.mubr.msk.f32.mxu1 %vm205_vm2, %v438_v24 }
 0x2b1   :  { %759 = vmatmul.mubr.msk.f32.gmra.mrb[6].mxu1 %vm205_vm2, %v439_v25 }
 0x380   :  { %v757_v30 = vpop.f32.mrb[4].mxu1 }
 0x381   :  { %v548_v31 = vadd.f32 %v757_v30, %v452_v28  ;;  %v542_v32 = vpop.f32.mrb[5].mxu1 }
 0x382   :  { %v543_v33 = vadd.f32 %v542_v32, %v447_v29 }
 0x383   :  { %v562_v34 = vmax.f32 %v548_v31, 0.0 }
 0x384   :  { %v561_v36 = vmax.f32 %v543_v33, 0.0  ;;  %v760_v37 = vpop.f32.mrb[6].mxu1 }
 0x385   :  { %v558_v39 = vadd.f32 %v760_v37, %v462_v35  ;;  %v552_v40 = vpop.f32.mrb[7].mxu1 }
 0x386   :  { %v797_v41 = vpack.c.bf16 %v562_v34, %v561_v36  ;;  %v553_v42 = vadd.f32 %v552_v40, %v457_v38 }
 0x387   :  { %v564_v43 = vmax.f32 %v558_v39, 0.0 }
 0x388   :  { %v563_v44 = vmax.f32 %v553_v42, 0.0  ;;  %798 = vmatpush3.bf16.msra.mxu0 %v797_v41 }
 0x389   :  { %799 = vmatprep.subr.bf16.mxu0 %v813_v26 }
 0x38a   :  { %v800_v45 = vpack.c.bf16 %v564_v43, %v563_v44 }
 0x38c   :  { %801 = vmatpush3.bf16.msra.mxu0 %v800_v45 }
 0x38f   :  { %770 = vmatmul.mubr.msk.f32.vlgmr.msra.gmra.mrb[8].mxu0 %vm205_vm2, %v565_v46 }
 0x462   :  { %v645_v52 = vpop.f32.mrb[8].mxu0 }
 0x463   :  { %v646_v53 = vadd.f32 %v645_v52, %v575_v51  ;;  %v771_v54 = vpop.f32.mrb[9].mxu0 }
 0x465   :  { %v649_v55 = vsub.f32 0.0, %v646_v53 }
 0x467   :  { %v650_v56 = vmul.f32 1.442695, %v649_v55 }
 0x469   :  { %808 = vpow2.f32 %v650_v56 }
 0x473   :  { %v809_v57 = vpop.eup %808 }
 0x474   :  { %v652_v58 = vadd.f32 1.0, %v809_v57 }
 0x476   :  { %810 = vrcp.f32 %v652_v58 }
 0x480   :  { %v811_v59 = vpop.eup %810 }
 0x481   :  { %654 = vst [vmem:[%s1020_s12] sm:$0x1] %v811_v59 }

</bundles_post_ra>
